<compile_context>
chip_gen: v7x
topology: tpu7x:2x2x1
jax: 0.10.0
libtpu: 0.0.40
codegen_flags: <defaults>
</compile_context>

<pallas_src>
import functools

import jax
import jax.numpy as jnp
from jax.experimental import pallas as pl
from jax.experimental.pallas import tpu as pltpu


def _round_up(x: int, m: int) -> int:
    return ((x + m - 1) // m) * m


def _hw_defaults():
    """Generation-aware (tb_target, ts_target, physical_vmem_bytes)."""
    phys_vmem = 64 * 1024 * 1024  # conservative default (v7x per-TC VMEM)
    try:
        info = pltpu.get_tpu_info()
        phys_vmem = int(getattr(info, "vmem_capacity_bytes", phys_vmem)) or phys_vmem
    except Exception:
        pass
    if phys_vmem >= 96 * 1024 * 1024:
        # v5e / v6e: 128 MiB physical VMEM -> bigger steps amortize grid overhead.
        return 256, 4096, phys_vmem
    # v7x: 64 MiB physical VMEM -> keep double-buffered footprint modest.
    return 256, 2048, phys_vmem


def _reinforce_kernel(*refs, clip_eps: float, has_mask: bool, true_s: int,
                      ts: int, needs_col_mask: bool):
    """PPO surrogate + masked row-mean, accumulated over S tiles.

    refs layout:
      has_mask=True : lp, olp, rw, mask, out, num_acc, den_acc
      has_mask=False: lp, olp, rw,       out, num_acc
    """
    if has_mask:
        lp_ref, olp_ref, rw_ref, m_ref, out_ref, num_acc, den_acc = refs
    else:
        lp_ref, olp_ref, rw_ref, out_ref, num_acc = refs
        m_ref = den_acc = None

    k = pl.program_id(1)

    @pl.when(k == 0)
    def _init():
        num_acc[...] = jnp.zeros_like(num_acc)
        if has_mask:
            den_acc[...] = jnp.zeros_like(den_acc)

    # Cast inside the kernel: inputs stream at native width (bf16/int8 friendly).
    lp = lp_ref[...].astype(jnp.float32)
    olp = olp_ref[...].astype(jnp.float32)
    rw = rw_ref[...].astype(jnp.float32)

    ratio = jnp.exp(lp - olp)                                       # EUP
    surr1 = ratio * rw
    surr2 = jnp.clip(ratio, 1.0 - clip_eps, 1.0 + clip_eps * 1.3) * rw
    loss = -jnp.minimum(surr1, surr2)

    col_valid = None
    if needs_col_mask:
        # Ragged boundary S-tile: columns >= true_s hold stale/garbage VMEM.
        # Select (not multiply) so garbage NaN/Inf never reaches the sums.
        col = k * ts + jax.lax.broadcasted_iota(jnp.int32, loss.shape, 1)
        col_valid = col < true_s
        loss = jnp.where(col_valid, loss, 0.0)

    if has_mask:
        m = m_ref[...].astype(jnp.float32)
        if needs_col_mask:
            m = jnp.where(col_valid, m, 0.0)
        num_acc[...] += jnp.sum(loss * m, axis=-1, keepdims=True)   # (TB, 1)
        den_acc[...] += jnp.sum(m, axis=-1, keepdims=True)          # (TB, 1)
    else:
        num_acc[...] += jnp.sum(loss, axis=-1, keepdims=True)

    @pl.when(k == pl.num_programs(1) - 1)
    def _finalize():
        if has_mask:
            # Matches reference semantics: rows with all-zero mask produce NaN.
            per_row = num_acc[...] / den_acc[...]
        else:
            per_row = num_acc[...] * (1.0 / true_s)
        # Lane-dense write (TB, 128); wrapper reads lane 0.  Rows beyond B in
        # the boundary block are dropped by Pallas' bounded writeback.
        out_ref[...] = jnp.broadcast_to(per_row, out_ref.shape)


def reinforce_policy_loss(log_probs, old_log_probs, rewards, action_mask=None,
                          kl=None, kl_coef: float = 0.0, clip_eps: float = 0.2,
                          tb_target=None, ts_target=None):
    """Pallas wrapper. Inputs are (B, S); returns a scalar float32 loss.

    Inputs are streamed in their caller-provided dtype (pass bf16 activations
    and bf16/int8 masks for lowest HBM traffic); the kernel upcasts to f32.
    `kl` / `kl_coef` are accepted for API parity with the PyTorch module (unused).
    """
    del kl, kl_coef  # unused by the reference forward as well
    B, S = log_probs.shape
    has_mask = action_mask is not None

    hw_tb, hw_ts, phys_vmem = _hw_defaults()
    tb_target = hw_tb if tb_target is None else int(tb_target)
    ts_target = hw_ts if ts_target is None else int(ts_target)
    tb_target = max(8, (tb_target // 8) * 8)
    ts_target = max(128, (ts_target // 128) * 128)

    # B tiling: keep >= 2 batch tiles whenever B > 8 so the "parallel" axis can
    # shard across v7x's two TensorCores; TB is a multiple of 8 unless it equals B.
    if B <= 8:
        TB = B
    else:
        TB = min(tb_target, _round_up(-(-B // 2), 8))
    # S tiling: single full-extent tile when small, else 128-aligned tiles;
    # the ragged boundary tile is masked in-kernel (no wrapper padding / copies).
    TS = S if S <= ts_target else ts_target

    n_bt = pl.cdiv(B, TB)
    n_st = pl.cdiv(S, TS)
    needs_col_mask = (S % TS) != 0

    if has_mask and action_mask.dtype == jnp.bool_:
        # bf16 is a cheap layout-safe representation for bool masks; callers can
        # also pass int8/bf16/f32 masks directly (the kernel casts internally).
        action_mask = action_mask.astype(jnp.bfloat16)

    inputs = [log_probs, old_log_probs, rewards]
    if has_mask:
        inputs.append(action_mask)

    data_spec = pl.BlockSpec((TB, TS), lambda i, k: (i, k))
    in_specs = [data_spec] * len(inputs)
    out_spec = pl.BlockSpec((TB, 128), lambda i, k: (i, 0))

    scratch = [pltpu.VMEM((TB, 1), jnp.float32)]          # num accumulator
    if has_mask:
        scratch.append(pltpu.VMEM((TB, 1), jnp.float32))  # den accumulator

    kernel = functools.partial(
        _reinforce_kernel,
        clip_eps=float(clip_eps),
        has_mask=has_mask,
        true_s=int(S),
        ts=int(TS),
        needs_col_mask=bool(needs_col_mask),
    )

    # Scoped-VMEM budget: double-buffered input + output blocks, lane-padded
    # scratch ((TB,1) f32 occupies TB*128*4 bytes), 1.5x headroom, clamped well
    # under the physical VMEM of the detected generation.
    bytes_per_elem = sum(jnp.dtype(x.dtype).itemsize for x in inputs)
    in_block_bytes = TB * TS * bytes_per_elem
    out_block_bytes = TB * 128 * 4
    scratch_bytes = len(scratch) * TB * 128 * 4
    needed = 2 * (in_block_bytes + out_block_bytes) + scratch_bytes
    vmem_cap = (phys_vmem * 5) // 8
    vmem_limit = int(min(max(needed + needed // 2, 4 * 1024 * 1024), vmem_cap))

    out = pl.pallas_call(
        kernel,
        out_shape=jax.ShapeDtypeStruct((B, 128), jnp.float32),
        grid=(n_bt, n_st),
        in_specs=in_specs,
        out_specs=out_spec,
        scratch_shapes=scratch,
        compiler_params=pltpu.CompilerParams(
            dimension_semantics=("parallel", "arbitrary"),
            vmem_limit_bytes=vmem_limit,
        ),
    )(*inputs)

    per_row = out[:, 0]           # per-row masked means
    return per_row.mean()


def _reference(log_probs, old_log_probs, rewards, action_mask, clip_eps=0.2):
    ratio = jnp.exp(log_probs.astype(jnp.float32) - old_log_probs.astype(jnp.float32))
    rw = rewards.astype(jnp.float32)
    surr1 = ratio * rw
    surr2 = jnp.clip(ratio, 1 - clip_eps, 1 + clip_eps * 1.3) * rw
    loss = -jnp.minimum(surr1, surr2)
    if action_mask is None:
        per_row = loss.mean(-1)
    else:
        m = action_mask.astype(jnp.float32)
        per_row = (loss * m).sum(-1) / m.sum(-1)
    return per_row.mean()


if __name__ == "__main__":
    key = jax.random.PRNGKey(0)
    k1, k2, k3, k4 = jax.random.split(key, 4)

    # --- Case 1: small shape, single tile, masked (matches module defaults) ---
    B, S = 2, 8
    log_probs = jax.random.normal(k1, (B, S), dtype=jnp.float32) * 0.1 - 1.0
    old_log_probs = jax.random.normal(k2, (B, S), dtype=jnp.float32) * 0.1 - 1.0
    rewards = jax.random.normal(k3, (B, S), dtype=jnp.float32)
    action_mask = (jax.random.uniform(k4, (B, S)) > 0.3).astype(jnp.float32)
    action_mask = action_mask.at[:, 0].set(1.0)

    out = jax.block_until_ready(
        reinforce_policy_loss(log_probs, old_log_probs, rewards, action_mask))
    ref = _reference(log_probs, old_log_probs, rewards, action_mask)
    assert jnp.allclose(out, ref, atol=1e-5, rtol=1e-5), (out, ref)

    # --- Case 2: ragged shape forcing multi-tile grid + in-kernel tail mask ---
    B2, S2 = 10, 200
    j1, j2, j3, j4 = jax.random.split(jax.random.PRNGKey(1), 4)
    lp2 = jax.random.normal(j1, (B2, S2), dtype=jnp.float32) * 0.1 - 1.0
    olp2 = jax.random.normal(j2, (B2, S2), dtype=jnp.float32) * 0.1 - 1.0
    rw2 = jax.random.normal(j3, (B2, S2), dtype=jnp.float32)
    m2 = (jax.random.uniform(j4, (B2, S2)) > 0.3).astype(jnp.float32)
    m2 = m2.at[:, 0].set(1.0)

    out2 = jax.block_until_ready(
        reinforce_policy_loss(lp2, olp2, rw2, m2, tb_target=8, ts_target=128))
    ref2 = _reference(lp2, olp2, rw2, m2)
    assert jnp.allclose(out2, ref2, atol=1e-5, rtol=1e-5), (out2, ref2)

    # --- Case 3: no action_mask (reference falls back to plain row mean) ---
    out3 = jax.block_until_ready(
        reinforce_policy_loss(lp2, olp2, rw2, None, tb_target=8, ts_target=128))
    ref3 = _reference(lp2, olp2, rw2, None)
    assert jnp.allclose(out3, ref3, atol=1e-5, rtol=1e-5), (out3, ref3)

    # --- Case 4: narrow dtypes end-to-end (bf16 inputs + bool mask), default tiles ---
    lp4 = lp2.astype(jnp.bfloat16)
    olp4 = olp2.astype(jnp.bfloat16)
    rw4 = rw2.astype(jnp.bfloat16)
    m4 = m2 > 0.5  # bool mask
    out4 = jax.block_until_ready(reinforce_policy_loss(lp4, olp4, rw4, m4))
    ref4 = _reference(lp4, olp4, rw4, m4)
    assert jnp.allclose(out4, ref4, atol=1e-4, rtol=1e-4), (out4, ref4)

    print("KERNEL_OK")
</pallas_src>

<mosaic_0001>
module attributes {stable_mosaic.version = 11 : i64} {
  func.func @_reinforce_kernel(%arg0: i32, %arg1: i32, %arg2: memref<2x8xf32, #tpu.memory_space<vmem>>, %arg3: memref<2x8xf32, #tpu.memory_space<vmem>>, %arg4: memref<2x8xf32, #tpu.memory_space<vmem>>, %arg5: memref<2x8xf32, #tpu.memory_space<vmem>>, %arg6: memref<2x128xf32, #tpu.memory_space<vmem>>, %arg7: memref<2x1xf32, #tpu.memory_space<vmem>>, %arg8: memref<2x1xf32, #tpu.memory_space<vmem>>) attributes {dimension_semantics = [#tpu.dimension_semantics<parallel>, #tpu.dimension_semantics<arbitrary>], iteration_bounds = array<i64: 1, 1>, scalar_prefetch = 0 : i64, scratch_operands = 2 : i64, tpu.core_type = #tpu.core_type<tc>, window_params = [{transform_indices = @transform_0, window_bounds = array<i64: 2, 8>}, {transform_indices = @transform_1, window_bounds = array<i64: 2, 8>}, {transform_indices = @transform_2, window_bounds = array<i64: 2, 8>}, {transform_indices = @transform_3, window_bounds = array<i64: 2, 8>}, {transform_indices = @transform_4, window_bounds = array<i64: 2, 128>}]} {
    %c0_i32 = arith.constant 0 : i32
    %0 = arith.cmpi eq, %arg1, %c0_i32 : i32
    %1 = arith.extui %0 : i1 to i32
    %c0_i32_0 = arith.constant 0 : i32
    %2 = arith.cmpi ne, %1, %c0_i32_0 : i32
    scf.if %2 {
      %cst_22 = arith.constant 0.000000e+00 : f32
      %32 = vector.broadcast %cst_22 : f32 to vector<2x1xf32>
      %c0_23 = arith.constant 0 : index
      %c0_24 = arith.constant 0 : index
      %33 = vector.load %arg7[%c0_23, %c0_24] : memref<2x1xf32, #tpu.memory_space<vmem>>, vector<2x1xf32>
      tpu.vector_store %arg7[%c0_23, %c0_24], %32 {strides = array<i32>} : memref<2x1xf32, #tpu.memory_space<vmem>>, vector<2x1xf32>,
      %cst_25 = arith.constant 0.000000e+00 : f32
      %34 = vector.broadcast %cst_25 : f32 to vector<2x1xf32>
      %c0_26 = arith.constant 0 : index
      %c0_27 = arith.constant 0 : index
      %35 = vector.load %arg8[%c0_26, %c0_27] : memref<2x1xf32, #tpu.memory_space<vmem>>, vector<2x1xf32>
      tpu.vector_store %arg8[%c0_26, %c0_27], %34 {strides = array<i32>} : memref<2x1xf32, #tpu.memory_space<vmem>>, vector<2x1xf32>,
    } else {
    }
    %c0 = arith.constant 0 : index
    %c0_1 = arith.constant 0 : index
    %3 = vector.load %arg2[%c0, %c0_1] : memref<2x8xf32, #tpu.memory_space<vmem>>, vector<2x8xf32>
    %c0_2 = arith.constant 0 : index
    %c0_3 = arith.constant 0 : index
    %4 = vector.load %arg3[%c0_2, %c0_3] : memref<2x8xf32, #tpu.memory_space<vmem>>, vector<2x8xf32>
    %c0_4 = arith.constant 0 : index
    %c0_5 = arith.constant 0 : index
    %5 = vector.load %arg4[%c0_4, %c0_5] : memref<2x8xf32, #tpu.memory_space<vmem>>, vector<2x8xf32>
    %6 = arith.subf %3, %4 : vector<2x8xf32>
    %7 = math.exp %6 : vector<2x8xf32>
    %8 = arith.mulf %7, %5 : vector<2x8xf32>
    %cst = arith.constant 8.000000e-01 : f32
    %cst_6 = arith.constant 1.260000e+00 : f32
    %9 = vector.broadcast %cst : f32 to vector<2x8xf32>
    %10 = arith.maximumf %9, %7 : vector<2x8xf32>
    %11 = vector.broadcast %cst_6 : f32 to vector<2x8xf32>
    %12 = arith.minimumf %11, %10 : vector<2x8xf32>
    %13 = arith.mulf %12, %5 : vector<2x8xf32>
    %14 = arith.minimumf %8, %13 : vector<2x8xf32>
    %cst_7 = arith.constant 0.000000e+00 : f32
    %15 = vector.broadcast %cst_7 : f32 to vector<2x8xf32>
    %16 = arith.subf %15, %14 : vector<2x8xf32>
    %c0_8 = arith.constant 0 : index
    %c0_9 = arith.constant 0 : index
    %17 = vector.load %arg5[%c0_8, %c0_9] : memref<2x8xf32, #tpu.memory_space<vmem>>, vector<2x8xf32>
    %c0_10 = arith.constant 0 : index
    %c0_11 = arith.constant 0 : index
    %18 = vector.load %arg7[%c0_10, %c0_11] : memref<2x1xf32, #tpu.memory_space<vmem>>, vector<2x1xf32>
    %19 = arith.mulf %16, %17 : vector<2x8xf32>
    %cst_12 = arith.constant dense<0.000000e+00> : vector<2xf32>
    %20 = vector.multi_reduction <add>, %19, %cst_12 [1] : vector<2x8xf32> to vector<2xf32>
    %21 = vector.shape_cast %20 : vector<2xf32> to vector<2x1xf32>
    %22 = arith.addf %18, %21 : vector<2x1xf32>
    %c0_13 = arith.constant 0 : index
    %c0_14 = arith.constant 0 : index
    %23 = vector.load %arg7[%c0_13, %c0_14] : memref<2x1xf32, #tpu.memory_space<vmem>>, vector<2x1xf32>
    tpu.vector_store %arg7[%c0_13, %c0_14], %22 {strides = array<i32>} : memref<2x1xf32, #tpu.memory_space<vmem>>, vector<2x1xf32>,
    %c0_15 = arith.constant 0 : index
    %c0_16 = arith.constant 0 : index
    %24 = vector.load %arg8[%c0_15, %c0_16] : memref<2x1xf32, #tpu.memory_space<vmem>>, vector<2x1xf32>
    %cst_17 = arith.constant dense<0.000000e+00> : vector<2xf32>
    %25 = vector.multi_reduction <add>, %17, %cst_17 [1] : vector<2x8xf32> to vector<2xf32>
    %26 = vector.shape_cast %25 : vector<2xf32> to vector<2x1xf32>
    %27 = arith.addf %24, %26 : vector<2x1xf32>
    %c0_18 = arith.constant 0 : index
    %c0_19 = arith.constant 0 : index
    %28 = vector.load %arg8[%c0_18, %c0_19] : memref<2x1xf32, #tpu.memory_space<vmem>>, vector<2x1xf32>
    tpu.vector_store %arg8[%c0_18, %c0_19], %27 {strides = array<i32>} : memref<2x1xf32, #tpu.memory_space<vmem>>, vector<2x1xf32>,
    %c0_i32_20 = arith.constant 0 : i32
    %29 = arith.cmpi eq, %arg1, %c0_i32_20 : i32
    %30 = arith.extui %29 : i1 to i32
    %c0_i32_21 = arith.constant 0 : i32
    %31 = arith.cmpi ne, %30, %c0_i32_21 : i32
    scf.if %31 {
      %c0_22 = arith.constant 0 : index
      %c0_23 = arith.constant 0 : index
      %32 = vector.load %arg7[%c0_22, %c0_23] : memref<2x1xf32, #tpu.memory_space<vmem>>, vector<2x1xf32>
      %c0_24 = arith.constant 0 : index
      %c0_25 = arith.constant 0 : index
      %33 = vector.load %arg8[%c0_24, %c0_25] : memref<2x1xf32, #tpu.memory_space<vmem>>, vector<2x1xf32>
      %34 = arith.divf %32, %33 : vector<2x1xf32>
      %35 = vector.shape_cast %34 : vector<2x1xf32> to vector<2x1xf32>
      %36 = vector.broadcast %35 : vector<2x1xf32> to vector<2x128xf32>
      %c0_26 = arith.constant 0 : index
      %c0_27 = arith.constant 0 : index
      %37 = vector.load %arg6[%c0_26, %c0_27] : memref<2x128xf32, #tpu.memory_space<vmem>>, vector<2x128xf32>
      tpu.vector_store %arg6[%c0_26, %c0_27], %36 {strides = array<i32>} : memref<2x128xf32, #tpu.memory_space<vmem>>, vector<2x128xf32>,
    } else {
    }
    return
  }
  func.func @transform_0(%arg0: i32, %arg1: i32) -> (i32, i32) {
    %c0_i32 = arith.constant 0 : i32
    return %arg0, %arg1 : i32, i32
  }
  func.func @transform_1(%arg0: i32, %arg1: i32) -> (i32, i32) {
    %c0_i32 = arith.constant 0 : i32
    return %arg0, %arg1 : i32, i32
  }
  func.func @transform_2(%arg0: i32, %arg1: i32) -> (i32, i32) {
    %c0_i32 = arith.constant 0 : i32
    return %arg0, %arg1 : i32, i32
  }
  func.func @transform_3(%arg0: i32, %arg1: i32) -> (i32, i32) {
    %c0_i32 = arith.constant 0 : i32
    return %arg0, %arg1 : i32, i32
  }
  func.func @transform_4(%arg0: i32, %arg1: i32) -> (i32, i32) {
    %c0_i32 = arith.constant 0 : i32
    %c0_i32_0 = arith.constant 0 : i32
    return %arg0, %c0_i32 : i32, i32
  }
}

</mosaic_0001>

<bundles_post_ra>
// kernel: tpu_custom_call.1
= control target key start
LH: loop header
LB: loop body
LE: loop exit
PB: predicated region body
PF: predicated region fallthrough
CT: control target
= control target key end

     0   :  { %9 = vsyncpa [#allocation5], 0  ;;  %s219_s0 = inlined_call_operand.hbm [shape: f32[2,8], index: 0, kind: input, shape index: {}]   ;;  %s220_s1 = inlined_call_operand.vmem [shape: f32[2,8], index: 1, kind: input, shape index: {}]   ;;  %s221_s2 = inlined_call_operand.vmem [shape: f32[2,8], index: 2, kind: input, shape index: {}]   ;;  %s222_s3 = inlined_call_operand.vmem [shape: f32[2,8], index: 3, kind: input, shape index: {}]   ;;  %s223_s4 = inlined_call_operand.hbm [shape: f32[2,128], index: 4, kind: output, shape index: {}]  }
   0x1   :  { %10 = vsyncpa [#allocation6], 0  ;;  %s151_s15 = smov [#allocation4]   ;;  %s103_s19 = scalar_lea.hbm %s219_s0, 32 }
   0x2   :  { %s17_s16 = sshll.u32 %s151_s15, 4  ;;  %p104_p0 = scmp.ne.s32.totalorder %s219_s0, %s103_s19  ;;  %s18_s16 = int_to_ptr.vmem [resolvable:$true] %s17_s16 }
   0x3   :  { %p107_p1 = scmp.lt.u32.totalorder %s103_s19, %s219_s0 }
   0x5   :  { %p109_p2 = pnand %p107_p1, %p104_p0 }
   0x7   :  { %112 = shalt.err (!%p109_p2)
}
   0x8   :  { %s113_s24 = scalar_lea.vmem %s18_s16, 32  ;;  %p118_p4 = scmp.lt.s32.totalorder %s18_s16, %s18_s16 }
   0x9   :  { %p114_p3 = scmp.ne.s32.totalorder %s18_s16, %s113_s24  ;;  %p119_p5 = scmp.lt.s32.totalorder %s113_s24, %s113_s24 }
   0xb   :  { %p120_p6 = por %p119_p5, %p118_p4 }
   0xd   :  { %p121_p7 = pnand %p120_p6, %p114_p3 }
   0xf   :  { %124 = shalt.err (!%p121_p7)
}
  0x10   :  { %20 = dma.hbm_to_vmem [thread:$0]  %s219_s0, 32, %s18_s16, [#allocation5]  }
  0x11   :  { %147 = dma.done.wait [#allocation5], 32  }
  0x12   :  { %148 = vsyncadd [#allocation5], 4294967264  ;;  %vm34_vm0 = vcmask 1024   ;;  %v152_v0 = vmov 0.0   ;;  %vm52_vm1 = vcmask 58368   ;;  %v153_v17 = vmov 0  }
  0x13   :  { %36 = vst.msk [vmem:[#allocation3] sm:$0x3] %vm34_vm0, %v152_v0  ;;  %35 = vst.msk [vmem:[#allocation2] sm:$0x3] %vm34_vm0, %v152_v0  ;;  %v49_v1 = vld [vmem:[%s222_s3] sm:$0x3]  ;;  %97 = vset.pattern.permute.xlu1 %v153_v17  ;;  %98 = vset.pattern.permute.xlu0 %v153_v17 }
  0x14   :  { %v37_v2 = vld [vmem:[#allocation4] sm:$0x3]  ;;  %v38_v3 = vld [vmem:[%s220_s1] sm:$0x3]  ;;  %v60_v4 = vsel %vm52_vm1, %v49_v1, 0.0  ;;  %s154_s1 = smov [#allocation7]  }
  0x15   :  { %v40_v5 = vsub.f32 %v37_v2, %v38_v3  ;;  %61 = vadd.xlane.f32.xlu0 %v60_v4  ;;  %v39_v8 = vld [vmem:[%s221_s2] sm:$0x3]  ;;  %s84_s2 = sshll.u32 %s154_s1, 4  ;;  %s85_s2 = int_to_ptr.vmem [resolvable:$true] %s84_s2 }
  0x16   :  { %s125_s3 = scalar_lea.vmem %s85_s2, 32  ;;  %p130_p9 = scmp.lt.s32.totalorder %s85_s2, %s85_s2 }
  0x17   :  { %v41_v6 = vmul.f32 1.442695, %v40_v5  ;;  %p126_p8 = scmp.ne.s32.totalorder %s85_s2, %s125_s3  ;;  %p131_p10 = scmp.lt.s32.totalorder %s125_s3, %s125_s3 }
  0x19   :  { %99 = vpow2.f32 %v41_v6  ;;  %p132_p11 = por %p131_p10, %p130_p9 }
  0x1a   :  { %v59_v18 = vld [vmem:[#allocation3] sm:$0x3]  ;;  %v50_v22 = vld [vmem:[#allocation2] sm:$0x3] }
  0x1b   :  { %p133_p12 = pnand %p132_p11, %p126_p8 }
  0x23   :  { %v100_v7 = vpop.eup %99 }
  0x24   :  { %v44_v9 = vmax.f32 %v100_v7, 0.8  ;;  %v43_v10 = vmul.f32 %v100_v7, %v39_v8 }
  0x26   :  { %v45_v11 = vmin.f32 %v44_v9, 1.26 }
  0x28   :  { %v46_v12 = vmul.f32 %v45_v11, %v39_v8 }
  0x2a   :  { %v47_v13 = vmin.f32 %v43_v10, %v46_v12 }
  0x2c   :  { %v48_v14 = vsub.f32 0.0, %v47_v13 }
  0x2e   :  { %v51_v15 = vmul.f32 %v49_v1, %v48_v14 }
  0x30   :  { %v53_v16 = vsel %vm52_vm1, %v51_v15, 0.0 }
  0x31   :  { %54 = vadd.xlane.f32.xlu0 %v53_v16 }
  0xa2   :  { %v62_v19 = vpop.xlane.xlu0 %61 }
  0xa3   :  { %v63_v20 = vadd.f32 %v62_v19, %v59_v18 }
  0xa5   :  { %64 = vst.msk [vmem:[#allocation3] sm:$0x3] %vm34_vm0, %v63_v20 }
  0xac   :  { %v69_v21 = vld [vmem:[#allocation3] sm:$0x3] }
  0xad   :  { %101 = vrcp.f32 %v69_v21 }
  0xb7   :  { %v102_v25 = vpop.eup %101 }
  0xbe   :  { %v55_v23 = vpop.xlane.xlu0 %54 }
  0xbf   :  { %v56_v24 = vadd.f32 %v55_v23, %v50_v22 }
  0xc1   :  { %58 = vst.msk [vmem:[#allocation2] sm:$0x3] %vm34_vm0, %v56_v24 }
  0xc8   :  { %v68_v26 = vld [vmem:[#allocation2] sm:$0x3] }
  0xc9   :  { %v71_v27 = vmul.f32 %v102_v25, %v68_v26 }
  0xcb   :  { %74 = vperm.xlu1 %97, %v71_v27  }
 0x14a   :  { %v75_v28 = vpop.permute.xlu1 %74 }
 0x14b   :  { %77 = vst [vmem:[#allocation7] sm:$0x3] %v75_v28 }
 0x14c   :  { %136 = shalt.err (!%p133_p12)
}
 0x14d   :  { %s137_s8 = scalar_lea.hbm %s223_s4, 32 }
 0x14e   :  { %p138_p13 = scmp.ne.s32.totalorder %s223_s4, %s137_s8  ;;  %p141_p0 = scmp.lt.u32.totalorder %s137_s8, %s223_s4 }
 0x150   :  { %p143_p1 = pnand %p141_p0, %p138_p13 }
 0x152   :  { %146 = shalt.err (!%p143_p1)
}
 0x153   :  { %87 = dma.vmem_to_hbm [thread:$0]  %s85_s2, 32, %s223_s4, [#allocation6]  }
 0x154   :  { %149 = dma.done.wait [#allocation6], 32  }
 0x155   :  { %150 = vsyncadd [#allocation6], 4294967264 }
 0x156   :  { %91 = vsyncpa [#allocation5], 1 }
 0x157   :  { %92 = vsyncpa [#allocation6], 1 }

</bundles_post_ra>
